<compile_context>
chip_gen: v6e
topology: v6e:2x2x1
jax: 0.10.0
libtpu: 0.0.40
codegen_flags: <defaults>
</compile_context>

<pallas_src>
import functools

import jax
import jax.numpy as jnp
from jax.experimental import pallas as pl
from jax.experimental.pallas import tpu as pltpu


def _conv_bn_relu_kernel(x_ref, w_ref, mask_ref, scale_ref, shift_ref, o_ref,
                         *, img_w):
    """One batch element per grid step.

    x_ref    : (1, Cin, H*W)     flattened image, spatial on lanes
    w_ref    : (Cout, 9*Cin)     conv weights, column = (dy*3+dx)*Cin + ci
    mask_ref : (9, H*W)          per-tap validity mask (zero-padding halo)
    scale_ref: (Cout, 1)         folded BN scale  = gamma / sqrt(var + eps)
    shift_ref: (Cout, 1)         folded shift     = beta - mean*scale + bias*scale
    o_ref    : (1, Cout, H*W)    flattened output, spatial on lanes (lane-dense)
    """
    _, cin, hw = x_ref.shape

    x = x_ref[0]             # (Cin, HW)
    masks = mask_ref[...]    # (9, HW)

    # Build the im2col matrix once per block: each tap is a lane rotation of
    # the flattened image (XLU) masked for the 1-pixel zero padding.
    taps = []
    for dy in range(3):
        for dx in range(3):
            t = dy * 3 + dx
            off = (dy - 1) * img_w + (dx - 1)   # flat input offset of this tap
            if off == 0:
                shifted = x
            else:
                shifted = pltpu.roll(x, shift=(-off) % hw, axis=1)
            taps.append(shifted * masks[t:t + 1, :])
    im2col = jnp.concatenate(taps, axis=0)      # (9*Cin, HW)

    # Single MXU matmul with K = 9*Cin; f32 accumulation.
    y = jnp.dot(w_ref[...], im2col, preferred_element_type=jnp.float32)  # (Cout, HW)

    # Folded (conv bias + BatchNorm inference) + ReLU.
    y = y * scale_ref[...] + shift_ref[...]
    y = jnp.maximum(y, 0.0)
    o_ref[0] = y.astype(o_ref.dtype)


@functools.partial(jax.jit, static_argnames=("eps",))
def conv_bn_relu(x_nchw, w_oihw, bias, gamma, beta, running_mean, running_var,
                 eps=1e-5):
    """ConvBNReLU forward. x_nchw: (B, Cin, H, W) -> (B, Cout, H, W)."""
    B, Cin, H, W = x_nchw.shape
    Cout = w_oihw.shape[0]
    HW = H * W

    # ---- glue (all free reshapes / tiny parameter math; no pad, no transpose
    #      of the activation tensor) ----
    x_flat = x_nchw.reshape(B, Cin, HW)                               # free
    w_mat = jnp.transpose(w_oihw, (0, 2, 3, 1)).reshape(Cout, 9 * Cin)  # tiny

    scale = gamma * jax.lax.rsqrt(running_var + eps)                  # (Cout,)
    shift = beta - running_mean * scale + bias * scale                # bias folded in
    scale2 = scale.reshape(Cout, 1)
    shift2 = shift.reshape(Cout, 1)

    # Per-tap validity masks for the implicit 1-pixel zero padding.
    # Depend only on static H, W -> constant-folded at compile time.
    p = jnp.arange(HW)
    hh = p // W
    ww = p % W
    masks = jnp.stack(
        [((hh + dy - 1 >= 0) & (hh + dy - 1 < H) &
          (ww + dx - 1 >= 0) & (ww + dx - 1 < W))
         for dy in range(3) for dx in range(3)],
        axis=0).astype(x_nchw.dtype)                                  # (9, HW)

    kernel = functools.partial(_conv_bn_relu_kernel, img_w=W)

    out_flat = pl.pallas_call(
        kernel,
        out_shape=jax.ShapeDtypeStruct((B, Cout, HW), x_nchw.dtype),
        grid_spec=pltpu.PrefetchScalarGridSpec(
            num_scalar_prefetch=0,
            grid=(B,),
            in_specs=[
                pl.BlockSpec((1, Cin, HW), lambda b: (b, 0, 0)),
                pl.BlockSpec((Cout, 9 * Cin), lambda b: (0, 0)),
                pl.BlockSpec((9, HW), lambda b: (0, 0)),
                pl.BlockSpec((Cout, 1), lambda b: (0, 0)),
                pl.BlockSpec((Cout, 1), lambda b: (0, 0)),
            ],
            out_specs=pl.BlockSpec((1, Cout, HW), lambda b: (b, 0, 0)),
        ),
        compiler_params=pltpu.CompilerParams(
            dimension_semantics=("parallel",)),
    )(x_flat, w_mat, masks, scale2, shift2)

    return out_flat.reshape(B, Cout, H, W)                            # free


def _reference(x_nchw, w_oihw, bias, gamma, beta, running_mean, running_var,
               eps=1e-5):
    """Pure-JAX reference of the same forward pass (for validation)."""
    y = jax.lax.conv_general_dilated(
        x_nchw, w_oihw,
        window_strides=(1, 1),
        padding=((1, 1), (1, 1)),
        dimension_numbers=("NCHW", "OIHW", "NCHW"),
    )
    y = y + bias.reshape(1, -1, 1, 1)
    scale = gamma * jax.lax.rsqrt(running_var + eps)
    shift = beta - running_mean * scale
    y = y * scale.reshape(1, -1, 1, 1) + shift.reshape(1, -1, 1, 1)
    return jnp.maximum(y, 0.0)


if __name__ == "__main__":
    # Small shapes consistent with ConvBNReLU(nIn=4, nOut=8, ksize=3, stride=1, pad=1)
    B, Cin, Cout, H, W = 2, 4, 8, 16, 16

    key = jax.random.PRNGKey(0)
    k_x, k_w, k_b, k_g, k_bt, k_m, k_v = jax.random.split(key, 7)

    x = jax.random.normal(k_x, (B, Cin, H, W), dtype=jnp.float32)

    # Deterministic parameter init (synthetic, matching module's shapes).
    w = jax.random.normal(k_w, (Cout, Cin, 3, 3), dtype=jnp.float32) * 0.1
    bias = jax.random.normal(k_b, (Cout,), dtype=jnp.float32) * 0.1
    gamma = 1.0 + 0.1 * jax.random.normal(k_g, (Cout,), dtype=jnp.float32)
    beta = 0.1 * jax.random.normal(k_bt, (Cout,), dtype=jnp.float32)
    running_mean = 0.1 * jax.random.normal(k_m, (Cout,), dtype=jnp.float32)
    running_var = 1.0 + 0.1 * jax.random.uniform(k_v, (Cout,), dtype=jnp.float32)

    out = conv_bn_relu(x, w, bias, gamma, beta, running_mean, running_var)
    out = jax.block_until_ready(out)

    ref = _reference(x, w, bias, gamma, beta, running_mean, running_var)
    assert out.shape == (B, Cout, H, W), out.shape
    assert jnp.allclose(out, ref, rtol=1e-4, atol=1e-4), (
        float(jnp.max(jnp.abs(out - ref))))

    print("KERNEL_OK")
</pallas_src>

<mosaic_0001>
module attributes {stable_mosaic.version = 11 : i64} {
  func.func @_conv_bn_relu_kernel(%arg0: i32, %arg1: memref<1x4x256xf32, #tpu.memory_space<vmem>>, %arg2: memref<8x36xf32, #tpu.memory_space<vmem>>, %arg3: memref<9x256xf32, #tpu.memory_space<vmem>>, %arg4: memref<8x1xf32, #tpu.memory_space<vmem>>, %arg5: memref<8x1xf32, #tpu.memory_space<vmem>>, %arg6: memref<1x8x256xf32, #tpu.memory_space<vmem>>) attributes {dimension_semantics = [#tpu.dimension_semantics<parallel>], iteration_bounds = array<i64: 2>, scalar_prefetch = 0 : i64, scratch_operands = 0 : i64, tpu.core_type = #tpu.core_type<tc>, window_params = [{transform_indices = @transform_0, window_bounds = array<i64: 1, 4, 256>}, {pipeline_mode = #tpu.pipeline_mode<synchronous>, transform_indices = @transform_1, window_bounds = array<i64: 8, 36>}, {pipeline_mode = #tpu.pipeline_mode<synchronous>, transform_indices = @transform_2, window_bounds = array<i64: 9, 256>}, {pipeline_mode = #tpu.pipeline_mode<synchronous>, transform_indices = @transform_3, window_bounds = array<i64: 8, 1>}, {pipeline_mode = #tpu.pipeline_mode<synchronous>, transform_indices = @transform_4, window_bounds = array<i64: 8, 1>}, {transform_indices = @transform_5, window_bounds = array<i64: 1, 8, 256>}]} {
    %c0 = arith.constant 0 : index
    %c0_0 = arith.constant 0 : index
    %c0_1 = arith.constant 0 : index
    %0 = vector.load %arg1[%c0, %c0_0, %c0_1] : memref<1x4x256xf32, #tpu.memory_space<vmem>>, vector<1x4x256xf32>
    %1 = vector.shape_cast %0 : vector<1x4x256xf32> to vector<4x256xf32>
    %c0_2 = arith.constant 0 : index
    %c0_3 = arith.constant 0 : index
    %2 = vector.load %arg3[%c0_2, %c0_3] : memref<9x256xf32, #tpu.memory_space<vmem>>, vector<9x256xf32>
    %c17_i32 = arith.constant 17 : i32
    %3 = tpu.dynamic_rotate %1 by %c17_i32 dim 1 : vector<4x256xf32>, i32 -> vector<4x256xf32>
    %4 = vector.extract_strided_slice %2 {offsets = [0, 0], sizes = [1, 256], strides = [1, 1]} : vector<9x256xf32> to vector<1x256xf32>
    %5 = vector.broadcast %4 : vector<1x256xf32> to vector<4x256xf32>
    %6 = arith.mulf %3, %5 : vector<4x256xf32>
    %c16_i32 = arith.constant 16 : i32
    %7 = tpu.dynamic_rotate %1 by %c16_i32 dim 1 : vector<4x256xf32>, i32 -> vector<4x256xf32>
    %8 = vector.extract_strided_slice %2 {offsets = [1, 0], sizes = [1, 256], strides = [1, 1]} : vector<9x256xf32> to vector<1x256xf32>
    %9 = vector.broadcast %8 : vector<1x256xf32> to vector<4x256xf32>
    %10 = arith.mulf %7, %9 : vector<4x256xf32>
    %c15_i32 = arith.constant 15 : i32
    %11 = tpu.dynamic_rotate %1 by %c15_i32 dim 1 : vector<4x256xf32>, i32 -> vector<4x256xf32>
    %12 = vector.extract_strided_slice %2 {offsets = [2, 0], sizes = [1, 256], strides = [1, 1]} : vector<9x256xf32> to vector<1x256xf32>
    %13 = vector.broadcast %12 : vector<1x256xf32> to vector<4x256xf32>
    %14 = arith.mulf %11, %13 : vector<4x256xf32>
    %c1_i32 = arith.constant 1 : i32
    %15 = tpu.dynamic_rotate %1 by %c1_i32 dim 1 : vector<4x256xf32>, i32 -> vector<4x256xf32>
    %16 = vector.extract_strided_slice %2 {offsets = [3, 0], sizes = [1, 256], strides = [1, 1]} : vector<9x256xf32> to vector<1x256xf32>
    %17 = vector.broadcast %16 : vector<1x256xf32> to vector<4x256xf32>
    %18 = arith.mulf %15, %17 : vector<4x256xf32>
    %19 = vector.extract_strided_slice %2 {offsets = [4, 0], sizes = [1, 256], strides = [1, 1]} : vector<9x256xf32> to vector<1x256xf32>
    %20 = vector.broadcast %19 : vector<1x256xf32> to vector<4x256xf32>
    %21 = arith.mulf %1, %20 : vector<4x256xf32>
    %c255_i32 = arith.constant 255 : i32
    %22 = tpu.dynamic_rotate %1 by %c255_i32 dim 1 : vector<4x256xf32>, i32 -> vector<4x256xf32>
    %23 = vector.extract_strided_slice %2 {offsets = [5, 0], sizes = [1, 256], strides = [1, 1]} : vector<9x256xf32> to vector<1x256xf32>
    %24 = vector.broadcast %23 : vector<1x256xf32> to vector<4x256xf32>
    %25 = arith.mulf %22, %24 : vector<4x256xf32>
    %c241_i32 = arith.constant 241 : i32
    %26 = tpu.dynamic_rotate %1 by %c241_i32 dim 1 : vector<4x256xf32>, i32 -> vector<4x256xf32>
    %27 = vector.extract_strided_slice %2 {offsets = [6, 0], sizes = [1, 256], strides = [1, 1]} : vector<9x256xf32> to vector<1x256xf32>
    %28 = vector.broadcast %27 : vector<1x256xf32> to vector<4x256xf32>
    %29 = arith.mulf %26, %28 : vector<4x256xf32>
    %c240_i32 = arith.constant 240 : i32
    %30 = tpu.dynamic_rotate %1 by %c240_i32 dim 1 : vector<4x256xf32>, i32 -> vector<4x256xf32>
    %31 = vector.extract_strided_slice %2 {offsets = [7, 0], sizes = [1, 256], strides = [1, 1]} : vector<9x256xf32> to vector<1x256xf32>
    %32 = vector.broadcast %31 : vector<1x256xf32> to vector<4x256xf32>
    %33 = arith.mulf %30, %32 : vector<4x256xf32>
    %c239_i32 = arith.constant 239 : i32
    %34 = tpu.dynamic_rotate %1 by %c239_i32 dim 1 : vector<4x256xf32>, i32 -> vector<4x256xf32>
    %35 = vector.extract_strided_slice %2 {offsets = [8, 0], sizes = [1, 256], strides = [1, 1]} : vector<9x256xf32> to vector<1x256xf32>
    %36 = vector.broadcast %35 : vector<1x256xf32> to vector<4x256xf32>
    %37 = arith.mulf %34, %36 : vector<4x256xf32>
    %38 = tpu.concatenate %6, %10, %14, %18, %21, %25, %29, %33, %37 in 0 : vector<4x256xf32>, vector<4x256xf32>, vector<4x256xf32>, vector<4x256xf32>, vector<4x256xf32>, vector<4x256xf32>, vector<4x256xf32>, vector<4x256xf32>, vector<4x256xf32> -> vector<36x256xf32>
    %c0_4 = arith.constant 0 : index
    %c0_5 = arith.constant 0 : index
    %39 = vector.load %arg2[%c0_4, %c0_5] : memref<8x36xf32, #tpu.memory_space<vmem>>, vector<8x36xf32>
    %cst = arith.constant dense<0.000000e+00> : vector<8x256xf32>
    %40 = tpu.matmul %39, %38, %cst {dimension_numbers = #tpu.dot_dimension_numbers<[1], [0], [0], [1], [0, 0, 1, 1], [], []>} : vector<8x36xf32>, vector<36x256xf32>, vector<8x256xf32> -> vector<8x256xf32>
    %c0_6 = arith.constant 0 : index
    %c0_7 = arith.constant 0 : index
    %41 = vector.load %arg4[%c0_6, %c0_7] : memref<8x1xf32, #tpu.memory_space<vmem>>, vector<8x1xf32>
    %42 = vector.broadcast %41 : vector<8x1xf32> to vector<8x256xf32>
    %43 = arith.mulf %40, %42 : vector<8x256xf32>
    %c0_8 = arith.constant 0 : index
    %c0_9 = arith.constant 0 : index
    %44 = vector.load %arg5[%c0_8, %c0_9] : memref<8x1xf32, #tpu.memory_space<vmem>>, vector<8x1xf32>
    %45 = vector.broadcast %44 : vector<8x1xf32> to vector<8x256xf32>
    %46 = arith.addf %43, %45 : vector<8x256xf32>
    %cst_10 = arith.constant 0.000000e+00 : f32
    %47 = vector.broadcast %cst_10 : f32 to vector<8x256xf32>
    %48 = arith.maximumf %46, %47 : vector<8x256xf32>
    %c0_11 = arith.constant 0 : index
    %c0_12 = arith.constant 0 : index
    %c0_13 = arith.constant 0 : index
    %49 = vector.load %arg6[%c0_11, %c0_12, %c0_13] : memref<1x8x256xf32, #tpu.memory_space<vmem>>, vector<1x8x256xf32>
    %50 = vector.shape_cast %49 : vector<1x8x256xf32> to vector<8x256xf32>
    %51 = vector.shape_cast %48 : vector<8x256xf32> to vector<1x8x256xf32>
    tpu.vector_store %arg6[%c0_11, %c0_12, %c0_13], %51 {strides = array<i32>} : memref<1x8x256xf32, #tpu.memory_space<vmem>>, vector<1x8x256xf32>,
    return
  }
  func.func @transform_0(%arg0: i32) -> (i32, i32, i32) {
    %c0_i32 = arith.constant 0 : i32
    %c0_i32_0 = arith.constant 0 : i32
    %c0_i32_1 = arith.constant 0 : i32
    return %arg0, %c0_i32, %c0_i32_0 : i32, i32, i32
  }
  func.func @transform_1(%arg0: i32) -> (i32, i32) {
    %c0_i32 = arith.constant 0 : i32
    %c0_i32_0 = arith.constant 0 : i32
    %c0_i32_1 = arith.constant 0 : i32
    return %c0_i32, %c0_i32_0 : i32, i32
  }
  func.func @transform_2(%arg0: i32) -> (i32, i32) {
    %c0_i32 = arith.constant 0 : i32
    %c0_i32_0 = arith.constant 0 : i32
    %c0_i32_1 = arith.constant 0 : i32
    return %c0_i32, %c0_i32_0 : i32, i32
  }
  func.func @transform_3(%arg0: i32) -> (i32, i32) {
    %c0_i32 = arith.constant 0 : i32
    %c0_i32_0 = arith.constant 0 : i32
    %c0_i32_1 = arith.constant 0 : i32
    return %c0_i32, %c0_i32_0 : i32, i32
  }
  func.func @transform_4(%arg0: i32) -> (i32, i32) {
    %c0_i32 = arith.constant 0 : i32
    %c0_i32_0 = arith.constant 0 : i32
    %c0_i32_1 = arith.constant 0 : i32
    return %c0_i32, %c0_i32_0 : i32, i32
  }
  func.func @transform_5(%arg0: i32) -> (i32, i32, i32) {
    %c0_i32 = arith.constant 0 : i32
    %c0_i32_0 = arith.constant 0 : i32
    %c0_i32_1 = arith.constant 0 : i32
    return %arg0, %c0_i32, %c0_i32_0 : i32, i32, i32
  }
}

</mosaic_0001>

<bundles_post_ra>
// kernel: conv_bn_relu.1
= control target key start
LH: loop header
LB: loop body
LE: loop exit
PB: predicated region body
PF: predicated region fallthrough
CT: control target
= control target key end

     0   :  { %s664_s18 = smov 0   ;;  %s781_s0 = inlined_call_operand.vmem [shape: f32[2,4,256], index: 0, kind: input, shape index: {}]   ;;  %s782_s1 = inlined_call_operand.vmem [shape: f32[8,36], index: 1, kind: input, shape index: {}]   ;;  %s783_s2 = inlined_call_operand.vmem [shape: f32[9,256], index: 2, kind: input, shape index: {}]   ;;  %s784_s3 = inlined_call_operand.vmem [shape: f32[8,1], index: 3, kind: input, shape index: {}]   ;;  %s785_s4 = inlined_call_operand.vmem [shape: f32[8,1], index: 4, kind: input, shape index: {}]   ;;  %s786_s5 = inlined_call_operand.vmem [shape: f32[2,8,256], index: 5, kind: output, shape index: {}]  }
   0x1 LB: > { %s577_s19 = sadd.s32 4294967295, %s622_s18   ;;  %p581_p0 = scmp.ge.s32.totalorder %s622_s18, 1  ;;  %s622_s18 = sphi %s664_s18, %s15_s18  }
   0x2   : > { %p187_p1 = scmp.lt.s32.totalorder %s622_s18, 3 }
   0x4   : > { %p188_p2 = pnand %p581_p0, %p187_p1 }
   0x5   : > { %p215_p3 = scmp.lt.s32.totalorder (!%p188_p2), %s577_s19, 1  ;;  %s624_s24 = smov (!%p188_p2), 111  }
   0x6   : > { %191 = sbr.rel (%p188_p2) target bundleno = 366 (0x16e), region = 40  ;;  %s625_s25 = smov (!%p188_p2), 112  }
   0x7   : > { %s626_s26 = smov (!%p188_p2), 127   ;;  %s627_s27 = smov (!%p188_p2), 113  }
   0x8   : > { %s628_s28 = smov (!%p188_p2), 1   ;;  %s629_s29 = smov (!%p188_p2), 16  }
   0x9   : > { %s632_s30 = smov (!%p188_p2), 15   ;;  %s633_s6 = smov (!%p188_p2), 17  }
   0xb   : > { %s788_s19 = smov (!%p215_p3, %s577_s19), 1  ;;  %v630_v2 = vmov 0.0   ;;  %v631_v3 = vmov 0   ;;  %v502_v4 = vld [vmem:[%s784_s3] sm:$0xff]  ;;  %v237_v6 = vlaneseq  ;;  %v707_v10 = vld [vmem:[%s783_s2 + $0x8] sm:$0xff]  ;;  %vm411_vm1 = vcmask 1043456  }
   0xc   : > { %s593_s20 = sshll.u32 %s788_s19, 3  ;;  %495 = vmatprep.mubr.f32.mxu0 %v630_v2  ;;  %613 = vset.pattern.permute.xlu0 %v631_v3  ;;  %v510_v5 = vld [vmem:[%s785_s4] sm:$0xff]  ;;  %v586_v18 = vld [vmem:[%s783_s2 + $0x10] ss:$0 sm:$0xff]  ;;  %v587_v19 = vld [vmem:[%s783_s2 + $0x18] ss:$0 sm:$0xff] }
   0xd   : > { %s219_s23 = scalar_lea.vmem %s781_s0, %s593_s20  ;;  %614 = vset.pattern.permute.xlu1 %v631_v3  ;;  %v696_v7 = vshrl.u32 %v237_v6, 7  ;;  %v702_v9 = vld [vmem:[%s783_s2] sm:$0xff]  ;;  %v709_v11 = vand.u32 127, %v237_v6  ;;  %vm421_vm9 = vcmask 293888  }
   0xe   : > { %v678_v0 = vld [vmem:[%s219_s23] sm:$0xff]  ;;  %s594_s23 = sshll.u32 %s788_s19, 4 }
   0xf   : > { %367 = vrot.lane.b32.xlu1 %v678_v0, %s624_s24  ;;  %350 = vrot.lane.b32.xlu0 %v678_v0, %s625_s25  ;;  %v231_v1 = vcombine.high %v678_v0, %v678_v0  ;;  %v305_v8 = vsub.s32 4, %v696_v7  ;;  %v325_v16 = vsub.s32 5, %v696_v7  ;;  %vm371_vm0 = vcmp.lt.s32.totalorder %v709_v11, 111 }
  0x10   : > { %v359_v17 = vsub.s32 7, %v696_v7  ;;  %vm320_vm2 = vcmp.lt.s32.totalorder %v709_v11, 127  ;;  %v342_v22 = vsub.s32 6, %v696_v7  ;;  %vm354_vm3 = vcmp.lt.s32.totalorder %v709_v11, 112 }
  0x11   : > { %v306_v14 = vrot.slane %v702_v9, %v305_v8  ;;  %v310_v15 = vrot.slane %v707_v10, %v305_v8  ;;  %v330_v26 = vrot.slane %v707_v10, %v325_v16  ;;  %v326_v31 = vrot.slane %v702_v9, %v325_v16 }
  0x12   : > { %v360_v29 = vrot.slane %v702_v9, %v359_v17  ;;  %v364_v30 = vrot.slane %v707_v10, %v359_v17  ;;  %vm337_vm4 = vcmp.lt.s32.totalorder %v709_v11, 113  ;;  %v343_v34 = vrot.slane %v702_v9, %v342_v22 }
  0x13   : > { %316 = vrot.lane.b32.xlu0 %v678_v0, %s626_s26  ;;  %369 = vrot.lane.b32.xlu1 %v231_v1, %s624_s24  ;;  %v313_v23 = vcombine.low %v306_v14, %v310_v15  ;;  %v347_v43 = vrot.slane %v707_v10, %v342_v22  ;;  %v295_v47 = vsub.s32 3, %v696_v7  ;;  %vm290_vm5 = vcmp.lt.s32.totalorder %v709_v11, 1 }
  0x14   : > { %v261_v63 = vsub.s32 1, %v696_v7  ;;  %v278_v3 = vsub.s32 2, %v696_v7  ;;  %vm256_vm6 = vcmp.lt.s32.totalorder %v709_v11, 16  ;;  %v244_v8 = vsub.s32 0, %v696_v7 }
  0x15   : > { %v315_v35 = vmul.f32 %v313_v23, %v678_v0  ;;  %v296_v61 = vrot.slane %v702_v9, %v295_v47  ;;  %v300_v62 = vrot.slane %v707_v10, %v295_v47  ;;  %vm273_vm7 = vcmp.lt.s32.totalorder %v709_v11, 15 }
  0x16   : > { %v262_v14 = vrot.slane %v702_v9, %v261_v63  ;;  %v266_v15 = vrot.slane %v707_v10, %v261_v63  ;;  %v279_v16 = vrot.slane %v702_v9, %v278_v3  ;;  %v283_v17 = vrot.slane %v707_v10, %v278_v3 }
  0x17   : > { %318 = vrot.lane.b32.xlu1 %v231_v1, %s626_s26  ;;  %352 = vrot.lane.b32.xlu0 %v231_v1, %s625_s25  ;;  %v397_v51 = vcombine.high %v315_v35, %v315_v35  ;;  %vm239_vm8 = vcmp.lt.s32.totalorder %v709_v11, 17  ;;  %v245_v7 = vrot.slane %v702_v9, %v244_v8  ;;  %v249_v22 = vrot.slane %v707_v10, %v244_v8  ;;  %s224_s26 = scalar_lea.vmem %s786_s5, %s594_s23 }
  0x1b   : > { %335 = vrot.lane.b32.xlu1 %v231_v1, %s627_s27  ;;  %333 = vrot.lane.b32.xlu0 %v678_v0, %s627_s27 }
  0x1f   : > { %288 = vrot.lane.b32.xlu1 %v231_v1, %s628_s28  ;;  %286 = vrot.lane.b32.xlu0 %v678_v0, %s628_s28 }
  0x23   : > { %254 = vrot.lane.b32.xlu1 %v231_v1, %s629_s29  ;;  %252 = vrot.lane.b32.xlu0 %v678_v0, %s629_s29 }
  0x27   : > { %271 = vrot.lane.b32.xlu1 %v231_v1, %s632_s30  ;;  %269 = vrot.lane.b32.xlu0 %v678_v0, %s632_s30 }
  0x2b   : > { %235 = vrot.lane.b32.xlu1 %v231_v1, %s633_s6  ;;  %233 = vrot.lane.b32.xlu0 %v678_v0, %s633_s6 }
  0x2f   : > { %505 = vperm.xlu0 %613, %v502_v4   ;;  %513 = vperm.xlu1 %614, %v510_v5  }
  0x81   : > { %v368_v12 = vpop.permute.xlu1 %367  ;;  %v351_v13 = vpop.permute.xlu0 %350 }
  0x85   : > { %v317_v20 = vpop.permute.xlu0 %316  ;;  %v370_v21 = vpop.permute.xlu1 %369 }
  0x86   : > { %v372_v24 = vsel %vm371_vm0, %v368_v12, %v370_v21  ;;  %v373_v25 = vsel %vm371_vm0, %v370_v21, %v368_v12 }
  0x87   : > { %v382_v27 = vmul.f32 %v586_v18, %v372_v24  ;;  %v383_v28 = vmul.f32 %v587_v19, %v373_v25 }
  0x89   : > { %588 = vmatprep.subr.msk.mxu0 %vm411_vm1, %v383_v28  ;;  %v319_v32 = vpop.permute.xlu1 %318  ;;  %v353_v33 = vpop.permute.xlu0 %352 }
  0x8a   : > { %v321_v36 = vsel %vm320_vm2, %v317_v20, %v319_v32  ;;  %v322_v37 = vsel %vm320_vm2, %v319_v32, %v317_v20  ;;  %v355_v38 = vsel %vm354_vm3, %v351_v13, %v353_v33  ;;  %v356_v39 = vsel %vm354_vm3, %v353_v33, %v351_v13  ;;  %589 = vmatpush1.msk.msra.mxu0 %vm411_vm1, %v382_v27 }
  0x8b   : > { %v332_v40 = vmul.f32 %v330_v26, %v322_v37  ;;  %v365_v41 = vmul.f32 %v360_v29, %v355_v38  ;;  %v366_v42 = vmul.f32 %v364_v30, %v356_v39  ;;  %v331_v44 = vmul.f32 %v326_v31, %v321_v36 }
  0x8d   : > { %v336_v45 = vpop.permute.xlu1 %335  ;;  %v334_v46 = vpop.permute.xlu0 %333  ;;  %v402_v48 = vrot.slane %v332_v40, 4  ;;  %v407_v52 = vrot.slane %v365_v41, 4  ;;  %v408_v53 = vrot.slane %v366_v42, 4  ;;  %v401_v56 = vrot.slane %v331_v44, 4  ;;  %v420_v41 = vld [vmem:[%s782_s1] sm:$0xff] }
  0x8e   : > { %v338_v49 = vsel %vm337_vm4, %v334_v46, %v336_v45  ;;  %v339_v50 = vsel %vm337_vm4, %v336_v45, %v334_v46 }
  0x8f   : > { %v348_v54 = vmul.f32 %v343_v34, %v338_v49  ;;  %v349_v55 = vmul.f32 %v347_v43, %v339_v50  ;;  %v417_v2 = vsel %vm411_vm1, %v397_v51, %v402_v48  ;;  %v416_v4 = vsel %vm411_vm1, %v315_v35, %v401_v56 }
  0x91   : > { %v289_v57 = vpop.permute.xlu1 %288  ;;  %v287_v58 = vpop.permute.xlu0 %286  ;;  %v419_v59 = vsel %vm411_vm1, %v349_v55, %v408_v53  ;;  %v418_v60 = vsel %vm411_vm1, %v348_v54, %v407_v52 }
  0x92   : > { %455 = vmatprep.subr.mxu0 %v419_v59  ;;  %v291_v0 = vsel %vm290_vm5, %v287_v58, %v289_v57  ;;  %v292_v1 = vsel %vm290_vm5, %v289_v57, %v287_v58 }
  0x93   : > { %456 = vmatpush1.msra.mxu0 %v418_v60  ;;  %v301_v12 = vmul.f32 %v296_v61, %v292_v1  ;;  %v302_v13 = vmul.f32 %v300_v62, %v291_v0 }
  0x94   : > { %457 = vmatprep.subr.mxu0 %v417_v2 }
  0x95   : > { %v255_v5 = vpop.permute.xlu1 %254  ;;  %458 = vmatpush1.msra.mxu0 %v416_v4  ;;  %v253_v6 = vpop.permute.xlu0 %252  ;;  %v392_v23 = vrot.slane %v301_v12, 4  ;;  %v393_v24 = vrot.slane %v302_v13, 4 }
  0x96   : > { %v257_v18 = vsel %vm256_vm6, %v253_v6, %v255_v5  ;;  %v258_v19 = vsel %vm256_vm6, %v255_v5, %v253_v6 }
  0x97   : > { %v267_v27 = vmul.f32 %v262_v14, %v258_v19  ;;  %v268_v28 = vmul.f32 %v266_v15, %v257_v18 }
  0x99   : > { %v272_v20 = vpop.permute.xlu1 %271  ;;  %v270_v21 = vpop.permute.xlu0 %269  ;;  %v386_v10 = vrot.slane %v267_v27, 4  ;;  %v387_v36 = vrot.slane %v268_v28, 4 }
  0x9a   : > { %v274_v25 = vsel %vm273_vm7, %v270_v21, %v272_v20  ;;  %v275_v26 = vsel %vm273_vm7, %v272_v20, %v270_v21 }
  0x9b   : > { %v284_v29 = vmul.f32 %v279_v16, %v275_v26  ;;  %v285_v30 = vmul.f32 %v283_v17, %v274_v25 }
  0x9d   : > { %v236_v31 = vpop.permute.xlu1 %235  ;;  %v234_v32 = vpop.permute.xlu0 %233  ;;  %v415_v33 = vsel %vm411_vm1, %v285_v30, %v393_v24  ;;  %v414_v34 = vsel %vm411_vm1, %v284_v29, %v392_v23 }
  0x9e   : > { %v240_v35 = vsel %vm239_vm8, %v234_v32, %v236_v31  ;;  %v241_v9 = vsel %vm239_vm8, %v236_v31, %v234_v32  ;;  %459 = vmatprep.subr.mxu0 %v415_v33 }
  0x9f   : > { %v250_v37 = vmul.f32 %v245_v7, %v241_v9  ;;  %v251_v38 = vmul.f32 %v249_v22, %v240_v35  ;;  %460 = vmatpush1.msra.mxu0 %v414_v34 }
  0xa1   : > { %v413_v39 = vsel %vm411_vm1, %v251_v38, %v387_v36  ;;  %v412_v40 = vsel %vm411_vm1, %v250_v37, %v386_v10 }
  0xa2   : > { %461 = vmatprep.subr.mxu0 %v413_v39 }
  0xa3   : > { %462 = vmatpush1.msra.mxu0 %v412_v40 }
  0xa4   : > { %590 = vmatmul.mubr.msk.f32.vlgmr.msra.gmra.mxu0 %vm421_vm9, %v420_v41 }
  0xaa   : > { %v506_v11 = vpop.permute.xlu0 %505  ;;  %v514_v43 = vpop.permute.xlu1 %513 }
 0x164   : > { %v497_v42 = vpop.f32.mrf.mxu0 }
 0x165   : > { %v508_v44 = vmul.f32 %v506_v11, %v497_v42 }
 0x166   : > { %v499_v45 = vpop.f32.mrf.mxu0 }
 0x167   : > { %v516_v46 = vadd.f32 %v514_v43, %v508_v44  ;;  %v509_v47 = vmul.f32 %v506_v11, %v499_v45 }
 0x169   : > { %v518_v48 = vmax.f32 %v516_v46, 0.0  ;;  %v517_v49 = vadd.f32 %v514_v43, %v509_v47 }
 0x16b   : > { %520 = vst [vmem:[%s224_s26] sm:$0xff] %v518_v48  ;;  %v519_v50 = vmax.f32 %v517_v49, 0.0 }
 0x16d   : > { %521 = vst [vmem:[%s224_s26 + $0x8] sm:$0xff] %v519_v50 }
 0x16e PF: > { %s15_s18 = sadd.s32 1, %s622_s18  }
 0x16f   : > { %p12_p4 = scmp.ge.s32.totalorder %s15_s18, 4  }
 0x171   :  { %14 = sbr.rel (!%p12_p4) target bundleno = 1 (0x1), region = 70 }

</bundles_post_ra>
